<compile_context>
chip_gen: v6e
topology: v6e:2x2x1
jax: 0.10.0
libtpu: 0.0.40
codegen_flags: <defaults>
</compile_context>

<pallas_src>
import functools

import jax
import jax.numpy as jnp
from jax.experimental import pallas as pl
from jax.experimental.pallas import tpu as pltpu

# Hyper-parameters implied by the module (small, TPU-friendly choices)
SEQ_LEN = 8          # MaxPool1d(8) + squeeze(dim=2) forces seq_len == 8
WORD_EMBED_SIZE = 32 # __C.WORD_EMBED_SIZE
ANSWER_SIZE = 128    # answer_size
OUT_SIZE = 256       # fc2 output size (fixed in the module)


def _round_up(x, m):
    return (x + m - 1) // m * m


def _ansnet_kernel(x_ref, w1_ref, b1_ref, w2_ref, b2_ref, o_ref):
    tb, L, E = x_ref.shape
    A = w1_ref.shape[1]
    # (TB, 8, 32) -> (TB*8, 32): minor (lane) dim unchanged, reshape is layout-free.
    x = x_ref[...].reshape(tb * L, E)
    # fc matmul on the MXU: (TB*8, 32) @ (32, A)
    h = jnp.dot(x, w1_ref[...], preferred_element_type=jnp.float32)
    # MaxPool1d(8, stride=1) over seq (len 8) == global max over the seq axis.
    m = jnp.max(h.reshape(tb, L, A), axis=1)                           # (TB, A)
    # Bias is constant along seq and ReLU is monotone, so both fold after the max.
    m = jnp.maximum(m + b1_ref[...], 0.0)
    # fc2 matmul on the MXU: (TB, A) @ (A, 256)
    o_ref[...] = (jnp.dot(m, w2_ref[...], preferred_element_type=jnp.float32)
                  + b2_ref[...])                                       # (TB, 256)


@functools.partial(jax.jit, static_argnames=("block_b",))
def ansnet_forward(ans, w_fc, b_fc, w_fc2, b_fc2, *, block_b=1024):
    """ans: (B, 8, E) f32.  Weights pre-transposed: w_fc (E, A), w_fc2 (A, 256)."""
    B, L, E = ans.shape
    A = w_fc.shape[1]
    O = w_fc2.shape[1]

    # Batch tile: multiple of 8 (sublane alignment), sized well under scoped VMEM
    # on all of v5e/v6e/v7x (TB=1024 -> ~2 MiB act + ~2 MiB out double-buffered
    # + ~4 MiB intermediate + ~150 KiB weights).
    tb = min(block_b, _round_up(B, 8))
    Bp = _round_up(B, tb)
    if Bp != B:
        ans = jnp.pad(ans, ((0, Bp - B), (0, 0), (0, 0)))

    cost = pl.CostEstimate(
        flops=2 * Bp * L * E * A + 2 * Bp * A * O,
        transcendentals=0,
        bytes_accessed=4 * (Bp * L * E + E * A + A + A * O + O + Bp * O),
    )

    out = pl.pallas_call(
        _ansnet_kernel,
        out_shape=jax.ShapeDtypeStruct((Bp, O), jnp.float32),
        grid_spec=pltpu.PrefetchScalarGridSpec(
            num_scalar_prefetch=0,
            grid=(Bp // tb,),
            in_specs=[
                pl.BlockSpec((tb, L, E), lambda b: (b, 0, 0)),  # activation tile
                pl.BlockSpec((E, A), lambda b: (0, 0)),         # fc weight (resident)
                pl.BlockSpec((1, A), lambda b: (0, 0)),         # fc bias
                pl.BlockSpec((A, O), lambda b: (0, 0)),         # fc2 weight (resident)
                pl.BlockSpec((1, O), lambda b: (0, 0)),         # fc2 bias
            ],
            out_specs=pl.BlockSpec((tb, O), lambda b: (b, 0)),
        ),
        compiler_params=pltpu.CompilerParams(
            dimension_semantics=("parallel",)),
        cost_estimate=cost,
    )(ans, w_fc, b_fc, w_fc2, b_fc2)

    return out[:B]


def reference_forward(ans, w_fc, b_fc, w_fc2, b_fc2):
    h = jnp.maximum(jnp.einsum("ble,ea->bla", ans, w_fc) + b_fc, 0.0)
    m = jnp.max(h, axis=1)                    # MaxPool1d(8) over seq of length 8 + squeeze
    return jnp.einsum("ba,ao->bo", m, w_fc2) + b_fc2


if __name__ == "__main__":
    key = jax.random.PRNGKey(0)
    k_x, k_w1, k_b1, k_w2, k_b2, k_x2 = jax.random.split(key, 6)

    # Small demo shapes consistent with the module (seq=8, embed=32).
    B = 2
    ans = jax.random.normal(k_x, (B, SEQ_LEN, WORD_EMBED_SIZE), dtype=jnp.float32)

    # Deterministic synthetic parameters (nn.Linear shapes, stored pre-transposed).
    w_fc = jax.random.normal(k_w1, (WORD_EMBED_SIZE, ANSWER_SIZE), dtype=jnp.float32) * 0.05
    b_fc = jax.random.normal(k_b1, (1, ANSWER_SIZE), dtype=jnp.float32) * 0.05
    w_fc2 = jax.random.normal(k_w2, (ANSWER_SIZE, OUT_SIZE), dtype=jnp.float32) * 0.05
    b_fc2 = jax.random.normal(k_b2, (1, OUT_SIZE), dtype=jnp.float32) * 0.05

    out = ansnet_forward(ans, w_fc, b_fc, w_fc2, b_fc2)
    out = jax.block_until_ready(out)
    ref = reference_forward(ans, w_fc, b_fc, w_fc2, b_fc2)
    assert out.shape == (B, OUT_SIZE)
    assert jnp.allclose(out, ref, atol=1e-4, rtol=1e-4), "mismatch vs reference (B=2)"

    # Also exercise the multi-step batched grid + remainder-padding path.
    B2, TB2 = 200, 64
    ans2 = jax.random.normal(k_x2, (B2, SEQ_LEN, WORD_EMBED_SIZE), dtype=jnp.float32)
    out2 = jax.block_until_ready(
        ansnet_forward(ans2, w_fc, b_fc, w_fc2, b_fc2, block_b=TB2))
    ref2 = reference_forward(ans2, w_fc, b_fc, w_fc2, b_fc2)
    assert out2.shape == (B2, OUT_SIZE)
    assert jnp.allclose(out2, ref2, atol=1e-4, rtol=1e-4), "mismatch vs reference (B=200)"

    print("KERNEL_OK")
</pallas_src>

<mosaic_0001>
module attributes {stable_mosaic.version = 11 : i64} {
  func.func @_ansnet_kernel(%arg0: i32, %arg1: memref<8x8x32xf32, #tpu.memory_space<vmem>>, %arg2: memref<32x128xf32, #tpu.memory_space<vmem>>, %arg3: memref<1x128xf32, #tpu.memory_space<vmem>>, %arg4: memref<128x256xf32, #tpu.memory_space<vmem>>, %arg5: memref<1x256xf32, #tpu.memory_space<vmem>>, %arg6: memref<8x256xf32, #tpu.memory_space<vmem>>) attributes {dimension_semantics = [#tpu.dimension_semantics<parallel>], iteration_bounds = array<i64: 1>, scalar_prefetch = 0 : i64, scratch_operands = 0 : i64, tpu.core_type = #tpu.core_type<tc>, window_params = [{transform_indices = @transform_0, window_bounds = array<i64: 8, 8, 32>}, {pipeline_mode = #tpu.pipeline_mode<synchronous>, transform_indices = @transform_1, window_bounds = array<i64: 32, 128>}, {pipeline_mode = #tpu.pipeline_mode<synchronous>, transform_indices = @transform_2, window_bounds = array<i64: 1, 128>}, {pipeline_mode = #tpu.pipeline_mode<synchronous>, transform_indices = @transform_3, window_bounds = array<i64: 128, 256>}, {pipeline_mode = #tpu.pipeline_mode<synchronous>, transform_indices = @transform_4, window_bounds = array<i64: 1, 256>}, {transform_indices = @transform_5, window_bounds = array<i64: 8, 256>}]} {
    %c0 = arith.constant 0 : index
    %c0_0 = arith.constant 0 : index
    %c0_1 = arith.constant 0 : index
    %0 = vector.load %arg1[%c0, %c0_0, %c0_1] : memref<8x8x32xf32, #tpu.memory_space<vmem>>, vector<8x8x32xf32>
    %1 = vector.shape_cast %0 : vector<8x8x32xf32> to vector<64x32xf32>
    %c0_2 = arith.constant 0 : index
    %c0_3 = arith.constant 0 : index
    %2 = vector.load %arg2[%c0_2, %c0_3] : memref<32x128xf32, #tpu.memory_space<vmem>>, vector<32x128xf32>
    %cst = arith.constant dense<0.000000e+00> : vector<64x128xf32>
    %3 = tpu.matmul %1, %2, %cst {dimension_numbers = #tpu.dot_dimension_numbers<[1], [0], [0], [1], [0, 0, 1, 1], [], []>} : vector<64x32xf32>, vector<32x128xf32>, vector<64x128xf32> -> vector<64x128xf32>
    %4 = vector.shape_cast %3 : vector<64x128xf32> to vector<8x8x128xf32>
    %cst_4 = arith.constant dense<0xFF800000> : vector<8x128xf32>
    %5 = vector.multi_reduction <maximumf>, %4, %cst_4 [1] : vector<8x8x128xf32> to vector<8x128xf32>
    %c0_5 = arith.constant 0 : index
    %c0_6 = arith.constant 0 : index
    %6 = vector.load %arg3[%c0_5, %c0_6] : memref<1x128xf32, #tpu.memory_space<vmem>>, vector<1x128xf32>
    %7 = vector.broadcast %6 : vector<1x128xf32> to vector<8x128xf32>
    %8 = arith.addf %5, %7 : vector<8x128xf32>
    %cst_7 = arith.constant 0.000000e+00 : f32
    %9 = vector.broadcast %cst_7 : f32 to vector<8x128xf32>
    %10 = arith.maximumf %8, %9 : vector<8x128xf32>
    %c0_8 = arith.constant 0 : index
    %c0_9 = arith.constant 0 : index
    %11 = vector.load %arg4[%c0_8, %c0_9] : memref<128x256xf32, #tpu.memory_space<vmem>>, vector<128x256xf32>
    %cst_10 = arith.constant dense<0.000000e+00> : vector<8x256xf32>
    %12 = tpu.matmul %10, %11, %cst_10 {dimension_numbers = #tpu.dot_dimension_numbers<[1], [0], [0], [1], [0, 0, 1, 1], [], []>} : vector<8x128xf32>, vector<128x256xf32>, vector<8x256xf32> -> vector<8x256xf32>
    %c0_11 = arith.constant 0 : index
    %c0_12 = arith.constant 0 : index
    %13 = vector.load %arg5[%c0_11, %c0_12] : memref<1x256xf32, #tpu.memory_space<vmem>>, vector<1x256xf32>
    %14 = vector.broadcast %13 : vector<1x256xf32> to vector<8x256xf32>
    %15 = arith.addf %12, %14 : vector<8x256xf32>
    %c0_13 = arith.constant 0 : index
    %c0_14 = arith.constant 0 : index
    %16 = vector.load %arg6[%c0_13, %c0_14] : memref<8x256xf32, #tpu.memory_space<vmem>>, vector<8x256xf32>
    tpu.vector_store %arg6[%c0_13, %c0_14], %15 {strides = array<i32>} : memref<8x256xf32, #tpu.memory_space<vmem>>, vector<8x256xf32>,
    return
  }
  func.func @transform_0(%arg0: i32) -> (i32, i32, i32) {
    %c0_i32 = arith.constant 0 : i32
    %c0_i32_0 = arith.constant 0 : i32
    %c0_i32_1 = arith.constant 0 : i32
    return %arg0, %c0_i32, %c0_i32_0 : i32, i32, i32
  }
  func.func @transform_1(%arg0: i32) -> (i32, i32) {
    %c0_i32 = arith.constant 0 : i32
    %c0_i32_0 = arith.constant 0 : i32
    %c0_i32_1 = arith.constant 0 : i32
    return %c0_i32, %c0_i32_0 : i32, i32
  }
  func.func @transform_2(%arg0: i32) -> (i32, i32) {
    %c0_i32 = arith.constant 0 : i32
    %c0_i32_0 = arith.constant 0 : i32
    %c0_i32_1 = arith.constant 0 : i32
    return %c0_i32, %c0_i32_0 : i32, i32
  }
  func.func @transform_3(%arg0: i32) -> (i32, i32) {
    %c0_i32 = arith.constant 0 : i32
    %c0_i32_0 = arith.constant 0 : i32
    %c0_i32_1 = arith.constant 0 : i32
    return %c0_i32, %c0_i32_0 : i32, i32
  }
  func.func @transform_4(%arg0: i32) -> (i32, i32) {
    %c0_i32 = arith.constant 0 : i32
    %c0_i32_0 = arith.constant 0 : i32
    %c0_i32_1 = arith.constant 0 : i32
    return %c0_i32, %c0_i32_0 : i32, i32
  }
  func.func @transform_5(%arg0: i32) -> (i32, i32) {
    %c0_i32 = arith.constant 0 : i32
    %c0_i32_0 = arith.constant 0 : i32
    return %arg0, %c0_i32 : i32, i32
  }
}

</mosaic_0001>

<bundles_post_ra>
// kernel: ansnet_forward.1
= control target key start
LH: loop header
LB: loop body
LE: loop exit
PB: predicated region body
PF: predicated region fallthrough
CT: control target
= control target key end

     0   :  { %10 = vsyncpa [#allocation3], 0  ;;  %s466_s18 = smov [#allocation2]   ;;  %s559_s0 = inlined_call_operand.vmem [shape: f32[8,8,32], index: 0, kind: input, shape index: {}]   ;;  %s560_s1 = inlined_call_operand.vmem [shape: f32[32,128], index: 1, kind: input, shape index: {}]   ;;  %s561_s2 = inlined_call_operand.vmem [shape: f32[1,128], index: 2, kind: input, shape index: {}]   ;;  %s562_s3 = inlined_call_operand.hbm [shape: f32[128,256], index: 3, kind: input, shape index: {}]   ;;  %s563_s4 = inlined_call_operand.vmem [shape: f32[1,256], index: 4, kind: input, shape index: {}]   ;;  %s564_s5 = inlined_call_operand.vmem [shape: f32[8,256], index: 5, kind: output, shape index: {}]  }
   0x1   :  { %s22_s19 = sshll.u32 %s466_s18, 4  ;;  %s23_s19 = int_to_ptr.vmem [resolvable:$true] %s22_s19 }
   0x2   :  { %s452_s20 = scalar_lea.vmem %s23_s19, 4096  ;;  %p457_p1 = scmp.lt.s32.totalorder %s23_s19, %s23_s19 }
   0x3   :  { %p453_p0 = scmp.ne.s32.totalorder %s23_s19, %s452_s20  ;;  %p458_p2 = scmp.lt.s32.totalorder %s452_s20, %s452_s20 }
   0x5   :  { %p459_p3 = por %p458_p2, %p457_p1 }
   0x7   :  { %p460_p4 = pnand %p459_p3, %p453_p0 }
   0x9   :  { %463 = shalt.err (!%p460_p4)
}
   0xa   :  { %s467_s21 = smov 256   ;;  %s468_s22 = smov 16  }
   0xb   :  { %28 = dma.hbm_to_vmem [thread:$0]  %s562_s3, 4096, %s23_s19, [#allocation3], %s467_s21, %s467_s21, %s468_s22  }
   0xc   :  { %464 = dma.done.wait [#allocation3], 4096  }
   0xd   :  { %465 = vsyncadd [#allocation3], 4294963200  ;;  %vm46_vm0 = vcmask 261120   ;;  %v45_v0 = vld [vmem:[%s560_s1 + $0x18] sm:$0xff]  ;;  %v44_v1 = vld [vmem:[%s560_s1 + $0x10] sm:$0xff]  ;;  %v469_v44 = vmov 0.0  }
   0xe   :  { %420 = vmatprep.subr.mxu0 %v45_v0  ;;  %v34_v2 = vld [vmem:[%s559_s0] sm:$0xff]  ;;  %v43_v3 = vld [vmem:[%s560_s1 + $0x8] sm:$0xff]  ;;  %v36_v6 = vld [vmem:[%s559_s0 + $0x10] sm:$0xff]  ;;  %385 = vmatprep.mubr.f32.mxu1 %v469_v44  ;;  %vm300_vm1 = vcmask 1041409   ;;  %vm303_vm2 = vcmask 1042434   ;;  %vm306_vm3 = vcmask 1043459  }
   0xf   :  { %421 = vmatpush3.msra.mxu0 %v45_v0  ;;  %428 = vmatprep.mubr.msk.f32.mxu0 %vm46_vm0, %v34_v2  ;;  %v42_v4 = vld [vmem:[%s560_s1] sm:$0xff]  ;;  %v35_v5 = vld [vmem:[%s559_s0 + $0x8] sm:$0xff]  ;;  %v37_v7 = vld [vmem:[%s559_s0 + $0x18] sm:$0xff]  ;;  %vm309_vm4 = vcmask 1044484   ;;  %vm312_vm5 = vcmask 1045509   ;;  %vm315_vm6 = vcmask 1046534  }
  0x10   :  { %422 = vmatprep.subr.mxu0 %v44_v1  ;;  %v38_v8 = vld [vmem:[%s559_s0 + $0x20] sm:$0xff]  ;;  %v39_v9 = vld [vmem:[%s559_s0 + $0x28] sm:$0xff]  ;;  %v40_v10 = vld [vmem:[%s559_s0 + $0x30] sm:$0xff]  ;;  %vm318_vm7 = vcmask 1047559  }
  0x11   :  { %423 = vmatpush3.msra.mxu0 %v44_v1  ;;  %v41_v11 = vld [vmem:[%s559_s0 + $0x38] sm:$0xff]  ;;  %v277_v13 = vld [vmem:[#allocation2 + $0xf0] sm:$0xff]  ;;  %v276_v14 = vld [vmem:[#allocation2 + $0xe8] sm:$0xff] }
  0x12   :  { %424 = vmatprep.subr.mxu0 %v43_v3  ;;  %v278_v12 = vld [vmem:[#allocation2 + $0xf8] sm:$0xff]  ;;  %v275_v15 = vld [vmem:[#allocation2 + $0xe0] sm:$0xff]  ;;  %v273_v17 = vld [vmem:[#allocation2 + $0xd0] sm:$0xff] }
  0x13   :  { %425 = vmatpush3.msra.mxu0 %v43_v3  ;;  %321 = vmatprep.subr.mxu1 %v278_v12  ;;  %v274_v16 = vld [vmem:[#allocation2 + $0xd8] sm:$0xff]  ;;  %v272_v18 = vld [vmem:[#allocation2 + $0xc8] sm:$0xff]  ;;  %v271_v19 = vld [vmem:[#allocation2 + $0xc0] sm:$0xff] }
  0x14   :  { %426 = vmatprep.subr.mxu0 %v42_v4  ;;  %322 = vmatpush1.msra.mxu1 %v277_v13  ;;  %v270_v20 = vld [vmem:[#allocation2 + $0xb8] sm:$0xff]  ;;  %v269_v21 = vld [vmem:[#allocation2 + $0xb0] sm:$0xff]  ;;  %v268_v22 = vld [vmem:[#allocation2 + $0xa8] sm:$0xff] }
  0x15   :  { %427 = vmatpush3.msra.mxu0 %v42_v4  ;;  %323 = vmatprep.subr.mxu1 %v276_v14  ;;  %v267_v23 = vld [vmem:[#allocation2 + $0xa0] sm:$0xff]  ;;  %v266_v24 = vld [vmem:[#allocation2 + $0x98] sm:$0xff]  ;;  %v265_v25 = vld [vmem:[#allocation2 + $0x90] sm:$0xff] }
  0x16   :  { %429 = vmatmul.mubr.msk.f32.vlgmr.msra.gmra.mxu0 %vm46_vm0, %v35_v5  ;;  %324 = vmatpush1.msra.mxu1 %v275_v15  ;;  %v264_v26 = vld [vmem:[#allocation2 + $0x88] sm:$0xff]  ;;  %v263_v27 = vld [vmem:[#allocation2 + $0x80] sm:$0xff]  ;;  %v262_v28 = vld [vmem:[#allocation2 + $0x78] sm:$0xff] }
  0x17   :  { %431 = vmatprep.mubr.msk.f32.mxu0 %vm46_vm0, %v36_v6  ;;  %325 = vmatprep.subr.mxu1 %v274_v16  ;;  %v261_v29 = vld [vmem:[#allocation2 + $0x70] sm:$0xff]  ;;  %v260_v30 = vld [vmem:[#allocation2 + $0x68] sm:$0xff]  ;;  %v259_v31 = vld [vmem:[#allocation2 + $0x60] sm:$0xff] }
  0x18   :  { %326 = vmatpush1.msra.mxu1 %v273_v17  ;;  %v258_v32 = vld [vmem:[#allocation2 + $0x58] sm:$0xff]  ;;  %v257_v33 = vld [vmem:[#allocation2 + $0x50] sm:$0xff]  ;;  %v256_v34 = vld [vmem:[#allocation2 + $0x48] sm:$0xff] }
  0x19   :  { %327 = vmatprep.subr.mxu1 %v272_v18  ;;  %v255_v35 = vld [vmem:[#allocation2 + $0x40] sm:$0xff]  ;;  %v254_v36 = vld [vmem:[#allocation2 + $0x38] sm:$0xff]  ;;  %v253_v37 = vld [vmem:[#allocation2 + $0x30] sm:$0xff] }
  0x1a   :  { %432 = vmatmul.mubr.msk.f32.gmra.mxu0 %vm46_vm0, %v37_v7  ;;  %328 = vmatpush1.msra.mxu1 %v271_v19  ;;  %v252_v38 = vld [vmem:[#allocation2 + $0x28] sm:$0xff]  ;;  %v251_v39 = vld [vmem:[#allocation2 + $0x20] sm:$0xff]  ;;  %v250_v40 = vld [vmem:[#allocation2 + $0x18] sm:$0xff] }
  0x1b   :  { %434 = vmatprep.mubr.msk.f32.mxu0 %vm46_vm0, %v38_v8  ;;  %329 = vmatprep.subr.mxu1 %v270_v20  ;;  %v249_v41 = vld [vmem:[#allocation2 + $0x10] sm:$0xff]  ;;  %v248_v42 = vld [vmem:[#allocation2 + $0x8] sm:$0xff]  ;;  %v247_v43 = vld [vmem:[#allocation2] sm:$0xff] }
  0x1c   :  { %330 = vmatpush1.msra.mxu1 %v269_v21  ;;  %v407_v0 = vld [vmem:[%s561_s2] ss:$0 sm:$0xff] }
  0x1d   :  { %331 = vmatprep.subr.mxu1 %v268_v22 }
  0x1e   :  { %435 = vmatmul.mubr.msk.f32.gmra.mxu0 %vm46_vm0, %v39_v9  ;;  %332 = vmatpush1.msra.mxu1 %v267_v23 }
  0x1f   :  { %437 = vmatprep.mubr.msk.f32.mxu0 %vm46_vm0, %v40_v10  ;;  %333 = vmatprep.subr.mxu1 %v266_v24 }
  0x20   :  { %334 = vmatpush1.msra.mxu1 %v265_v25 }
  0x21   :  { %335 = vmatprep.subr.mxu1 %v264_v26 }
  0x22   :  { %438 = vmatmul.mubr.msk.f32.gmra.mxu0 %vm46_vm0, %v41_v11  ;;  %336 = vmatpush1.msra.mxu1 %v263_v27 }
  0x23   :  { %337 = vmatprep.subr.mxu1 %v262_v28 }
  0x24   :  { %338 = vmatpush1.msra.mxu1 %v261_v29 }
  0x25   :  { %339 = vmatprep.subr.mxu1 %v260_v30 }
  0x26   :  { %340 = vmatpush1.msra.mxu1 %v259_v31 }
  0x27   :  { %341 = vmatprep.subr.mxu1 %v258_v32 }
  0x28   :  { %342 = vmatpush1.msra.mxu1 %v257_v33 }
  0x29   :  { %343 = vmatprep.subr.mxu1 %v256_v34 }
  0x2a   :  { %344 = vmatpush1.msra.mxu1 %v255_v35 }
  0x2b   :  { %345 = vmatprep.subr.mxu1 %v254_v36 }
  0x2c   :  { %346 = vmatpush1.msra.mxu1 %v253_v37 }
  0x2d   :  { %347 = vmatprep.subr.mxu1 %v252_v38 }
  0x2e   :  { %348 = vmatpush1.msra.mxu1 %v251_v39 }
  0x2f   :  { %349 = vmatprep.subr.mxu1 %v250_v40 }
  0x30   :  { %350 = vmatpush1.msra.mxu1 %v249_v41 }
  0x31   :  { %351 = vmatprep.subr.mxu1 %v248_v42 }
  0x32   :  { %352 = vmatpush1.msra.mxu1 %v247_v43 }
  0xd6   :  { %v430_v45 = vpop.f32.mrf.mxu0 }
  0xd7   :  { %v182_v46 = vrot.slane %v430_v45, 4 }
  0xd8   :  { %v137_v47 = vpop.f32.mrf.mxu0 }
  0xd9   :  { %v183_v48 = vmax.f32 %v430_v45, %v182_v46  ;;  %v176_v49 = vrot.slane %v137_v47, 4 }
  0xda   :  { %v433_v50 = vpop.f32.mrf.mxu0 }
  0xdb   :  { %v184_v51 = vrot.slane %v183_v48, 2  ;;  %v177_v52 = vmax.f32 %v137_v47, %v176_v49  ;;  %v194_v53 = vrot.slane %v433_v50, 4 }
  0xdc   :  { %v147_v54 = vpop.f32.mrf.mxu0 }
  0xdd   :  { %v185_v55 = vmax.f32 %v183_v48, %v184_v51  ;;  %v178_v56 = vrot.slane %v177_v52, 2  ;;  %v195_v57 = vmax.f32 %v433_v50, %v194_v53  ;;  %v188_v58 = vrot.slane %v147_v54, 4 }
  0xde   :  { %v436_v59 = vpop.f32.mrf.mxu0 }
  0xdf   :  { %v186_v60 = vrot.slane %v185_v55, 1  ;;  %v179_v61 = vmax.f32 %v177_v52, %v178_v56  ;;  %v196_v62 = vrot.slane %v195_v57, 2  ;;  %v189_v63 = vmax.f32 %v147_v54, %v188_v58 }
  0xe0   :  { %v206_v1 = vrot.slane %v436_v59, 4  ;;  %v157_v2 = vpop.f32.mrf.mxu0 }
  0xe1   :  { %v187_v3 = vmax.f32 %v185_v55, %v186_v60  ;;  %v180_v4 = vrot.slane %v179_v61, 1  ;;  %v197_v5 = vmax.f32 %v195_v57, %v196_v62  ;;  %v190_v6 = vrot.slane %v189_v63, 2 }
  0xe2   :  { %v207_v7 = vmax.f32 %v436_v59, %v206_v1  ;;  %v200_v8 = vrot.slane %v157_v2, 4  ;;  %v439_v9 = vpop.f32.mrf.mxu0 }
  0xe3   :  { %v232_v10 = vadd.f32 %v407_v0, %v187_v3  ;;  %v181_v11 = vmax.f32 %v179_v61, %v180_v4  ;;  %v198_v12 = vrot.slane %v197_v5, 1  ;;  %v191_v13 = vmax.f32 %v189_v63, %v190_v6 }
  0xe4   :  { %v208_v14 = vrot.slane %v207_v7, 2  ;;  %v201_v15 = vmax.f32 %v157_v2, %v200_v8  ;;  %v218_v16 = vrot.slane %v439_v9, 4  ;;  %v167_v17 = vpop.f32.mrf.mxu0 }
  0xe5   :  { %v199_v18 = vmax.f32 %v197_v5, %v198_v12  ;;  %v192_v19 = vrot.slane %v191_v13, 1  ;;  %v212_v23 = vrot.slane %v167_v17, 4  ;;  %v240_v24 = vmax.f32 %v232_v10, 0.0 }
  0xe6   :  { %v209_v20 = vmax.f32 %v207_v7, %v208_v14  ;;  %v202_v21 = vrot.slane %v201_v15, 2  ;;  %v219_v22 = vmax.f32 %v439_v9, %v218_v16  ;;  %v231_v25 = vadd.f32 %v407_v0, %v181_v11 }
  0xe7   :  { %v193_v26 = vmax.f32 %v191_v13, %v192_v19  ;;  %v213_v30 = vmax.f32 %v167_v17, %v212_v23  ;;  %v234_v31 = vadd.f32 %v407_v0, %v199_v18  ;;  %v299_v37 = vrot.slane %v240_v24, 7 }
  0xe8   :  { %v210_v27 = vrot.slane %v209_v20, 1  ;;  %v203_v28 = vmax.f32 %v201_v15, %v202_v21  ;;  %v220_v29 = vrot.slane %v219_v22, 2  ;;  %v239_v38 = vmax.f32 %v231_v25, 0.0 }
  0xe9   :  { %v233_v32 = vadd.f32 %v407_v0, %v193_v26  ;;  %v214_v36 = vrot.slane %v213_v30, 2  ;;  %v242_v43 = vmax.f32 %v234_v31, 0.0  ;;  %v281_v5 = vlaneseq }
  0xea   :  { %v211_v33 = vmax.f32 %v209_v20, %v210_v27  ;;  %v204_v34 = vrot.slane %v203_v28, 1  ;;  %v221_v35 = vmax.f32 %v219_v22, %v220_v29  ;;  %v301_v49 = vsel %vm300_vm1, %v299_v37, %v239_v38 }
  0xeb   :  { %v241_v39 = vmax.f32 %v233_v32, 0.0  ;;  %v215_v42 = vmax.f32 %v213_v30, %v214_v36  ;;  %v305_v54 = vrot.slane %v242_v43, 5  ;;  %v282_v6 = vshrl.u32 %v281_v5, 7 }
  0xec   :  { %v205_v40 = vmax.f32 %v203_v28, %v204_v34  ;;  %v222_v41 = vrot.slane %v221_v35, 1  ;;  %v236_v45 = vadd.f32 %v407_v0, %v211_v33 }
  0xed   :  { %v302_v44 = vrot.slane %v241_v39, 6  ;;  %v216_v48 = vrot.slane %v215_v42, 1  ;;  %v283_v7 = vsub.s32 0, %v282_v6  ;;  %v287_v8 = vsub.s32 1, %v282_v6 }
  0xee   :  { %v235_v46 = vadd.f32 %v407_v0, %v205_v40  ;;  %v223_v47 = vmax.f32 %v221_v35, %v222_v41  ;;  %v244_v55 = vmax.f32 %v236_v45, 0.0 }
  0xef   :  { %v217_v51 = vmax.f32 %v215_v42, %v216_v48  ;;  %v304_v53 = vsel %vm303_vm2, %v302_v44, %v301_v49 }
  0xf0   :  { %v243_v50 = vmax.f32 %v235_v46, 0.0  ;;  %v238_v52 = vadd.f32 %v407_v0, %v223_v47  ;;  %v307_v59 = vsel %vm306_vm3, %v305_v54, %v304_v53  ;;  %v311_v62 = vrot.slane %v244_v55, 3 }
  0xf1   :  { %v237_v57 = vadd.f32 %v407_v0, %v217_v51  ;;  %v279_v0 = vld [vmem:[%s563_s4] sm:$0x3] }
  0xf2   :  { %v308_v56 = vrot.slane %v243_v50, 4  ;;  %v246_v58 = vmax.f32 %v238_v52, 0.0  ;;  %v284_v9 = vrot.slane %v279_v0, %v283_v7  ;;  %v288_v10 = vrot.slane %v279_v0, %v287_v8 }
  0xf3   :  { %v245_v60 = vmax.f32 %v237_v57, 0.0 }
  0xf4   :  { %v310_v61 = vsel %vm309_vm4, %v308_v56, %v307_v59  ;;  %v317_v2 = vrot.slane %v246_v58, 1 }
  0xf5   :  { %v314_v63 = vrot.slane %v245_v60, 2  ;;  %v313_v1 = vsel %vm312_vm5, %v311_v62, %v310_v61 }
  0xf7   :  { %v316_v3 = vsel %vm315_vm6, %v314_v63, %v313_v1 }
  0xf8   :  { %v319_v4 = vsel %vm318_vm7, %v317_v2, %v316_v3 }
  0xf9   :  { %386 = vmatmul.mubr.f32.vlgmr.msra.gmra.mxu1 %v319_v4 }
 0x1b9   :  { %v387_v11 = vpop.f32.mrf.mxu1 }
 0x1ba   :  { %v388_v12 = vadd.f32 %v387_v11, %v284_v9 }
 0x1bb   :  { %v389_v13 = vpop.f32.mrf.mxu1 }
 0x1bc   :  { %392 = vst [vmem:[%s564_s5] sm:$0xff] %v388_v12  ;;  %v390_v14 = vadd.f32 %v389_v13, %v288_v10 }
 0x1be   :  { %393 = vst [vmem:[%s564_s5 + $0x8] sm:$0xff] %v390_v14 }
 0x1bf   :  { %398 = vsyncpa [#allocation3], 1 }

</bundles_post_ra>
